<compile_context>
chip_gen: v7x
topology: tpu7x:2x2x1
jax: 0.10.0
libtpu: 0.0.40
codegen_flags: <defaults>
</compile_context>

<pallas_src>
import jax
import jax.numpy as jnp
import numpy as np
from jax.experimental import pallas as pl
from jax.experimental.pallas import tpu as pltpu


def _decoder_kernel(x_ref, fcw_ref, fcb_ref,
                    g3_ref, c3_ref, g2_ref, c2_ref, g1_ref, c1_ref,
                    o_ref):
    """Whole decoder for one batch tile: 4 chained MXU matmuls + VPU bias/ReLU."""
    h = jnp.dot(x_ref[...], fcw_ref[...], preferred_element_type=jnp.float32)
    h = jnp.maximum(h + fcb_ref[...], 0.0)           # fc + ReLU      (bm, 16*nx)
    h = jnp.dot(h, g3_ref[...], preferred_element_type=jnp.float32)
    h = jnp.maximum(h + c3_ref[...], 0.0)            # conv3 + ReLU   (bm, 8*(nx+2))
    h = jnp.dot(h, g2_ref[...], preferred_element_type=jnp.float32)
    h = jnp.maximum(h + c2_ref[...], 0.0)            # conv2 + ReLU   (bm, 4*(nx+4))
    h = jnp.dot(h, g1_ref[...], preferred_element_type=jnp.float32)
    h = jnp.maximum(h + c1_ref[...], 0.0)            # conv1 + ReLU   (bm, nx+6)
    o_ref[...] = h.astype(o_ref.dtype)


def decoder_answer_pallas(x, kparams, *, batch_tile=512):
    fcw, fcb, g3, c3, g2, c2, g1, c1 = kparams
    B, L = x.shape
    d_fc = fcw.shape[1]
    d3 = g3.shape[1]
    d2 = g2.shape[1]
    d1 = g1.shape[1]
    nc = d1

    # One batch tile for small B; tile over a "parallel" grid axis for large B.
    bm = B if B <= batch_tile else batch_tile

    def const(shape):
        return pl.BlockSpec(shape, lambda i: (0, 0))

    out2d = pl.pallas_call(
        _decoder_kernel,
        out_shape=jax.ShapeDtypeStruct((B, nc), jnp.float32),
        grid=(pl.cdiv(B, bm),),
        in_specs=[
            pl.BlockSpec((bm, L), lambda i: (i, 0)),
            const((L, d_fc)), const((1, d_fc)),
            const((d_fc, d3)), const((1, d3)),
            const((d3, d2)), const((1, d2)),
            const((d2, d1)), const((1, d1)),
        ],
        out_specs=pl.BlockSpec((bm, nc), lambda i: (i, 0)),
        compiler_params=pltpu.CompilerParams(
            dimension_semantics=("parallel",)),
    )(x, fcw, fcb, g3, c3, g2, c2, g1, c1)

    # PyTorch NCHW output: (B, 1, 1, embed_dim)
    return out2d.reshape(B, 1, 1, nc)


def _tconv_as_banded_matrix(w, win):
    """ConvTranspose2d weight (Ci, Co, 1, K), stride 1 -> dense (Ci*win, Co*wout) matrix.

    Acts on channel-major flattened activations: flat_out = flat_in @ G.
    Output position rule (stride 1): input position p contributes to output p + k.
    """
    w = np.asarray(w, np.float32)
    ci, co, _, k = w.shape
    wout = win + k - 1
    g = np.zeros((ci, win, co, wout), np.float32)
    for kk in range(k):
        for p in range(win):
            g[:, p, :, p + kk] = w[:, :, 0, kk]
    return jnp.asarray(g.reshape(ci * win, co * wout))


def prep_kernel_params(p, nx):
    """One-time reshuffle of the module parameters into kernel-friendly form."""
    fcw = jnp.asarray(p["fc_w"], jnp.float32)                  # (L, 16*nx)
    fcb = jnp.asarray(p["fc_b"], jnp.float32).reshape(1, -1)   # (1, 16*nx)

    g3 = _tconv_as_banded_matrix(p["w3"], nx)                  # (16*nx,    8*(nx+2))
    g2 = _tconv_as_banded_matrix(p["w2"], nx + 2)              # (8*(nx+2), 4*(nx+4))
    g1 = _tconv_as_banded_matrix(p["w1"], nx + 4)              # (4*(nx+4), 1*(nx+6))

    def bias_row(b, wout):
        return jnp.asarray(
            np.repeat(np.asarray(b, np.float32), wout).reshape(1, -1))

    c3 = bias_row(p["b3"], nx + 2)
    c2 = bias_row(p["b2"], nx + 4)
    c1 = bias_row(p["b1"], nx + 6)
    return (fcw, fcb, g3, c3, g2, c2, g1, c1)


def init_params(key, embed_dim, latent_dim):
    """Deterministic synthetic parameters matching the nn.Module shapes."""
    nx = embed_dim - 6
    ks = jax.random.split(key, 8)
    s = 0.1
    return dict(
        fc_w=s * jax.random.normal(ks[0], (latent_dim, 16 * nx), jnp.float32),
        fc_b=s * jax.random.normal(ks[1], (16 * nx,), jnp.float32),
        # ConvTranspose2d weight layout: (in_ch, out_ch, kH, kW)
        w3=s * jax.random.normal(ks[2], (16, 8, 1, 3), jnp.float32),
        b3=s * jax.random.normal(ks[3], (8,), jnp.float32),
        w2=s * jax.random.normal(ks[4], (8, 4, 1, 3), jnp.float32),
        b2=s * jax.random.normal(ks[5], (4,), jnp.float32),
        w1=s * jax.random.normal(ks[6], (4, 1, 1, 3), jnp.float32),
        b1=s * jax.random.normal(ks[7], (1,), jnp.float32),
    )


def ref_forward(x, p, nx):
    """Pure-JAX reference implementing the PyTorch forward exactly (NCHW)."""
    B = x.shape[0]
    h = jax.nn.relu(x @ p["fc_w"] + p["fc_b"])
    h = h.reshape(B, 16, 1, nx)

    def tconv(h, W, b):
        B_, Ci, H, Win = h.shape
        Co = W.shape[1]
        y = jnp.zeros((B_, Co, H, Win + 2), jnp.float32)
        for kw in range(3):
            y = y.at[:, :, :, kw:kw + Win].add(
                jnp.einsum('bchw,cd->bdhw', h, W[:, :, 0, kw]))
        return jax.nn.relu(y + b[None, :, None, None])

    h = tconv(h, p["w3"], p["b3"])
    h = tconv(h, p["w2"], p["b2"])
    h = tconv(h, p["w1"], p["b1"])
    return h


if __name__ == "__main__":
    embed_dim = 38      # nc ; nx = embed_dim - 6 = 32
    latent_dim = 16
    seq_size = 8        # unused by the forward pass (the .view yields H == 1)
    batch = 4
    nx = embed_dim - 6

    key = jax.random.PRNGKey(0)
    kx, kp = jax.random.split(key)
    x = jax.random.normal(kx, (batch, latent_dim), jnp.float32)

    params = init_params(kp, embed_dim, latent_dim)
    kparams = prep_kernel_params(params, nx)

    out = decoder_answer_pallas(x, kparams)
    out = jax.block_until_ready(out)

    ref = ref_forward(x, params, nx)
    assert out.shape == (batch, 1, 1, embed_dim), out.shape
    np.testing.assert_allclose(np.asarray(out), np.asarray(ref), rtol=2e-2, atol=2e-2)
    print("KERNEL_OK")
</pallas_src>

<mosaic_0001>
module attributes {stable_mosaic.version = 11 : i64} {
  func.func @_decoder_kernel(%arg0: i32, %arg1: memref<4x16xf32, #tpu.memory_space<vmem>>, %arg2: memref<16x512xf32, #tpu.memory_space<vmem>>, %arg3: memref<1x512xf32, #tpu.memory_space<vmem>>, %arg4: memref<512x272xf32, #tpu.memory_space<vmem>>, %arg5: memref<1x272xf32, #tpu.memory_space<vmem>>, %arg6: memref<272x144xf32, #tpu.memory_space<vmem>>, %arg7: memref<1x144xf32, #tpu.memory_space<vmem>>, %arg8: memref<144x38xf32, #tpu.memory_space<vmem>>, %arg9: memref<1x38xf32, #tpu.memory_space<vmem>>, %arg10: memref<4x38xf32, #tpu.memory_space<vmem>>) attributes {dimension_semantics = [#tpu.dimension_semantics<parallel>], iteration_bounds = array<i64: 1>, scalar_prefetch = 0 : i64, scratch_operands = 0 : i64, tpu.core_type = #tpu.core_type<tc>, window_params = [{transform_indices = @transform_0, window_bounds = array<i64: 4, 16>}, {pipeline_mode = #tpu.pipeline_mode<synchronous>, transform_indices = @transform_1, window_bounds = array<i64: 16, 512>}, {pipeline_mode = #tpu.pipeline_mode<synchronous>, transform_indices = @transform_2, window_bounds = array<i64: 1, 512>}, {pipeline_mode = #tpu.pipeline_mode<synchronous>, transform_indices = @transform_3, window_bounds = array<i64: 512, 272>}, {pipeline_mode = #tpu.pipeline_mode<synchronous>, transform_indices = @transform_4, window_bounds = array<i64: 1, 272>}, {pipeline_mode = #tpu.pipeline_mode<synchronous>, transform_indices = @transform_5, window_bounds = array<i64: 272, 144>}, {pipeline_mode = #tpu.pipeline_mode<synchronous>, transform_indices = @transform_6, window_bounds = array<i64: 1, 144>}, {pipeline_mode = #tpu.pipeline_mode<synchronous>, transform_indices = @transform_7, window_bounds = array<i64: 144, 38>}, {pipeline_mode = #tpu.pipeline_mode<synchronous>, transform_indices = @transform_8, window_bounds = array<i64: 1, 38>}, {transform_indices = @transform_9, window_bounds = array<i64: 4, 38>}]} {
    %c0 = arith.constant 0 : index
    %c0_0 = arith.constant 0 : index
    %0 = vector.load %arg1[%c0, %c0_0] : memref<4x16xf32, #tpu.memory_space<vmem>>, vector<4x16xf32>
    %c0_1 = arith.constant 0 : index
    %c0_2 = arith.constant 0 : index
    %1 = vector.load %arg2[%c0_1, %c0_2] : memref<16x512xf32, #tpu.memory_space<vmem>>, vector<16x512xf32>
    %cst = arith.constant dense<0.000000e+00> : vector<4x512xf32>
    %2 = tpu.matmul %0, %1, %cst {dimension_numbers = #tpu.dot_dimension_numbers<[1], [0], [0], [1], [0, 0, 1, 1], [], []>} : vector<4x16xf32>, vector<16x512xf32>, vector<4x512xf32> -> vector<4x512xf32>
    %c0_3 = arith.constant 0 : index
    %c0_4 = arith.constant 0 : index
    %3 = vector.load %arg3[%c0_3, %c0_4] : memref<1x512xf32, #tpu.memory_space<vmem>>, vector<1x512xf32>
    %4 = vector.broadcast %3 : vector<1x512xf32> to vector<4x512xf32>
    %5 = arith.addf %2, %4 : vector<4x512xf32>
    %cst_5 = arith.constant 0.000000e+00 : f32
    %6 = vector.broadcast %cst_5 : f32 to vector<4x512xf32>
    %7 = arith.maximumf %5, %6 : vector<4x512xf32>
    %c0_6 = arith.constant 0 : index
    %c0_7 = arith.constant 0 : index
    %8 = vector.load %arg4[%c0_6, %c0_7] : memref<512x272xf32, #tpu.memory_space<vmem>>, vector<512x272xf32>
    %cst_8 = arith.constant dense<0.000000e+00> : vector<4x272xf32>
    %9 = tpu.matmul %7, %8, %cst_8 {dimension_numbers = #tpu.dot_dimension_numbers<[1], [0], [0], [1], [0, 0, 1, 1], [], []>} : vector<4x512xf32>, vector<512x272xf32>, vector<4x272xf32> -> vector<4x272xf32>
    %c0_9 = arith.constant 0 : index
    %c0_10 = arith.constant 0 : index
    %10 = vector.load %arg5[%c0_9, %c0_10] : memref<1x272xf32, #tpu.memory_space<vmem>>, vector<1x272xf32>
    %11 = vector.broadcast %10 : vector<1x272xf32> to vector<4x272xf32>
    %12 = arith.addf %9, %11 : vector<4x272xf32>
    %cst_11 = arith.constant 0.000000e+00 : f32
    %13 = vector.broadcast %cst_11 : f32 to vector<4x272xf32>
    %14 = arith.maximumf %12, %13 : vector<4x272xf32>
    %c0_12 = arith.constant 0 : index
    %c0_13 = arith.constant 0 : index
    %15 = vector.load %arg6[%c0_12, %c0_13] : memref<272x144xf32, #tpu.memory_space<vmem>>, vector<272x144xf32>
    %cst_14 = arith.constant dense<0.000000e+00> : vector<4x144xf32>
    %16 = tpu.matmul %14, %15, %cst_14 {dimension_numbers = #tpu.dot_dimension_numbers<[1], [0], [0], [1], [0, 0, 1, 1], [], []>} : vector<4x272xf32>, vector<272x144xf32>, vector<4x144xf32> -> vector<4x144xf32>
    %c0_15 = arith.constant 0 : index
    %c0_16 = arith.constant 0 : index
    %17 = vector.load %arg7[%c0_15, %c0_16] : memref<1x144xf32, #tpu.memory_space<vmem>>, vector<1x144xf32>
    %18 = vector.broadcast %17 : vector<1x144xf32> to vector<4x144xf32>
    %19 = arith.addf %16, %18 : vector<4x144xf32>
    %cst_17 = arith.constant 0.000000e+00 : f32
    %20 = vector.broadcast %cst_17 : f32 to vector<4x144xf32>
    %21 = arith.maximumf %19, %20 : vector<4x144xf32>
    %c0_18 = arith.constant 0 : index
    %c0_19 = arith.constant 0 : index
    %22 = vector.load %arg8[%c0_18, %c0_19] : memref<144x38xf32, #tpu.memory_space<vmem>>, vector<144x38xf32>
    %cst_20 = arith.constant dense<0.000000e+00> : vector<4x38xf32>
    %23 = tpu.matmul %21, %22, %cst_20 {dimension_numbers = #tpu.dot_dimension_numbers<[1], [0], [0], [1], [0, 0, 1, 1], [], []>} : vector<4x144xf32>, vector<144x38xf32>, vector<4x38xf32> -> vector<4x38xf32>
    %c0_21 = arith.constant 0 : index
    %c0_22 = arith.constant 0 : index
    %24 = vector.load %arg9[%c0_21, %c0_22] : memref<1x38xf32, #tpu.memory_space<vmem>>, vector<1x38xf32>
    %25 = vector.broadcast %24 : vector<1x38xf32> to vector<4x38xf32>
    %26 = arith.addf %23, %25 : vector<4x38xf32>
    %cst_23 = arith.constant 0.000000e+00 : f32
    %27 = vector.broadcast %cst_23 : f32 to vector<4x38xf32>
    %28 = arith.maximumf %26, %27 : vector<4x38xf32>
    %c0_24 = arith.constant 0 : index
    %c0_25 = arith.constant 0 : index
    %29 = vector.load %arg10[%c0_24, %c0_25] : memref<4x38xf32, #tpu.memory_space<vmem>>, vector<4x38xf32>
    tpu.vector_store %arg10[%c0_24, %c0_25], %28 {strides = array<i32>} : memref<4x38xf32, #tpu.memory_space<vmem>>, vector<4x38xf32>,
    return
  }
  func.func @transform_0(%arg0: i32) -> (i32, i32) {
    %c0_i32 = arith.constant 0 : i32
    %c0_i32_0 = arith.constant 0 : i32
    return %arg0, %c0_i32 : i32, i32
  }
  func.func @transform_1(%arg0: i32) -> (i32, i32) {
    %c0_i32 = arith.constant 0 : i32
    %c0_i32_0 = arith.constant 0 : i32
    %c0_i32_1 = arith.constant 0 : i32
    return %c0_i32, %c0_i32_0 : i32, i32
  }
  func.func @transform_2(%arg0: i32) -> (i32, i32) {
    %c0_i32 = arith.constant 0 : i32
    %c0_i32_0 = arith.constant 0 : i32
    %c0_i32_1 = arith.constant 0 : i32
    return %c0_i32, %c0_i32_0 : i32, i32
  }
  func.func @transform_3(%arg0: i32) -> (i32, i32) {
    %c0_i32 = arith.constant 0 : i32
    %c0_i32_0 = arith.constant 0 : i32
    %c0_i32_1 = arith.constant 0 : i32
    return %c0_i32, %c0_i32_0 : i32, i32
  }
  func.func @transform_4(%arg0: i32) -> (i32, i32) {
    %c0_i32 = arith.constant 0 : i32
    %c0_i32_0 = arith.constant 0 : i32
    %c0_i32_1 = arith.constant 0 : i32
    return %c0_i32, %c0_i32_0 : i32, i32
  }
  func.func @transform_5(%arg0: i32) -> (i32, i32) {
    %c0_i32 = arith.constant 0 : i32
    %c0_i32_0 = arith.constant 0 : i32
    %c0_i32_1 = arith.constant 0 : i32
    return %c0_i32, %c0_i32_0 : i32, i32
  }
  func.func @transform_6(%arg0: i32) -> (i32, i32) {
    %c0_i32 = arith.constant 0 : i32
    %c0_i32_0 = arith.constant 0 : i32
    %c0_i32_1 = arith.constant 0 : i32
    return %c0_i32, %c0_i32_0 : i32, i32
  }
  func.func @transform_7(%arg0: i32) -> (i32, i32) {
    %c0_i32 = arith.constant 0 : i32
    %c0_i32_0 = arith.constant 0 : i32
    %c0_i32_1 = arith.constant 0 : i32
    return %c0_i32, %c0_i32_0 : i32, i32
  }
  func.func @transform_8(%arg0: i32) -> (i32, i32) {
    %c0_i32 = arith.constant 0 : i32
    %c0_i32_0 = arith.constant 0 : i32
    %c0_i32_1 = arith.constant 0 : i32
    return %c0_i32, %c0_i32_0 : i32, i32
  }
  func.func @transform_9(%arg0: i32) -> (i32, i32) {
    %c0_i32 = arith.constant 0 : i32
    %c0_i32_0 = arith.constant 0 : i32
    return %arg0, %c0_i32 : i32, i32
  }
}

</mosaic_0001>

<bundles_post_ra>
// kernel: tpu_custom_call.1
= control target key start
LH: loop header
LB: loop body
LE: loop exit
PB: predicated region body
PF: predicated region fallthrough
CT: control target
= control target key end

     0   :  { %v1455_v5 = vmov 0.0   ;;  %vm64_vm0 = vcmask 130048   ;;  %s2441_s0 = inlined_call_operand.vmem [shape: f32[4,16], index: 0, kind: input, shape index: {}]   ;;  %s2442_s1 = inlined_call_operand.vmem [shape: f32[16,512], index: 1, kind: input, shape index: {}]   ;;  %s2443_s2 = inlined_call_operand.vmem [shape: f32[1,512], index: 2, kind: input, shape index: {}]   ;;  %s2444_s3 = inlined_call_operand.vmem [shape: f32[512,272], index: 3, kind: input, shape index: {}]   ;;  %s2445_s4 = inlined_call_operand.vmem [shape: f32[1,272], index: 4, kind: input, shape index: {}]   ;;  %s2446_s5 = inlined_call_operand.vmem [shape: f32[272,144], index: 5, kind: input, shape index: {}]   ;;  %s2447_s6 = inlined_call_operand.vmem [shape: f32[1,144], index: 6, kind: input, shape index: {}]   ;;  %s2448_s7 = inlined_call_operand.vmem [shape: f32[144,38], index: 7, kind: input, shape index: {}]   ;;  %s2449_s8 = inlined_call_operand.vmem [shape: f32[1,38], index: 8, kind: input, shape index: {}]   ;;  %s2450_s9 = inlined_call_operand.hbm [shape: f32[4,38], index: 9, kind: output, shape index: {}]  }
   0x1   :  { %v35_v0 = vld [vmem:[%s2442_s1 + $0x8] sm:$0xff]  ;;  %v34_v2 = vld [vmem:[%s2442_s1] sm:$0xff]  ;;  %132 = vmatprep.mubr.f32.mxu1 %v1455_v5  ;;  %v37_v6 = vld [vmem:[%s2442_s1 + $0x18] sm:$0xff] }
   0x2   :  { %v39_v1 = vld [vmem:[%s2442_s1 + $0x28] sm:$0xff]  ;;  %v38_v4 = vld [vmem:[%s2442_s1 + $0x20] sm:$0xff]  ;;  %v41_v9 = vld [vmem:[%s2442_s1 + $0x38] sm:$0xff] }
   0x3   :  { %v1125_v3 = vpack.c.bf16 %v39_v1, %v35_v0  ;;  %v1127_v7 = vpack.c.bf16 %v38_v4, %v34_v2  ;;  %v33_v8 = vld [vmem:[%s2441_s0] sm:$0xf]  ;;  %v36_v10 = vld [vmem:[%s2442_s1 + $0x10] sm:$0xff]  ;;  %v1129_v12 = vpack.c.bf16 %v41_v9, %v37_v6  ;;  %v215_v13 = vld [vmem:[%s2444_s3 + $0x8] sm:$0xff] }
   0x4   :  { %v40_v11 = vld [vmem:[%s2442_s1 + $0x30] sm:$0xff]  ;;  %v218_v14 = vld [vmem:[%s2444_s3 + $0x20] sm:$0xff]  ;;  %v217_v18 = vld [vmem:[%s2444_s3 + $0x18] sm:$0xff] }
   0x5   :  { %1126 = vmatprep.subr.bf16.mxu1 %v1125_v3  ;;  %v214_v15 = vld [vmem:[%s2444_s3] sm:$0xff]  ;;  %v1131_v16 = vpack.c.bf16 %v40_v11, %v36_v10  ;;  %v1133_v17 = vpack.c.bf16 %v218_v14, %v215_v13  ;;  %v221_v19 = vld [vmem:[%s2444_s3 + $0x38] sm:$0xff]  ;;  %v224_v20 = vld [vmem:[%s2444_s3 + $0x50] sm:$0xff] }
   0x6   :  { %1128 = vmatpush1.bf16.msra.mxu1 %v1127_v7  ;;  %v1135_v21 = vpack.c.bf16 %v217_v18, %v214_v15  ;;  %v1137_v22 = vpack.c.bf16 %v224_v20, %v221_v19  ;;  %v220_v23 = vld [vmem:[%s2444_s3 + $0x30] sm:$0xff]  ;;  %v223_v24 = vld [vmem:[%s2444_s3 + $0x48] sm:$0xff]  ;;  %v230_v26 = vld [vmem:[%s2444_s3 + $0x80] sm:$0xff] }
   0x7   :  { %1130 = vmatprep.subr.bf16.mxu1 %v1129_v12  ;;  %v227_v25 = vld [vmem:[%s2444_s3 + $0x68] sm:$0xff]  ;;  %1134 = vmatprep.subr.bf16.mxu0 %v1133_v17  ;;  %v1139_v27 = vpack.c.bf16 %v223_v24, %v220_v23  ;;  %v226_v29 = vld [vmem:[%s2444_s3 + $0x60] sm:$0xff]  ;;  %v229_v30 = vld [vmem:[%s2444_s3 + $0x78] sm:$0xff] }
   0x8   :  { %1136 = vmatpush1.bf16.msra.mxu0 %v1135_v21  ;;  %v1141_v28 = vpack.c.bf16 %v230_v26, %v227_v25  ;;  %v233_v31 = vld [vmem:[%s2444_s3 + $0x98] sm:$0xff]  ;;  %v236_v32 = vld [vmem:[%s2444_s3 + $0xb0] sm:$0xff]  ;;  %v1143_v33 = vpack.c.bf16 %v229_v30, %v226_v29  ;;  %v235_v36 = vld [vmem:[%s2444_s3 + $0xa8] sm:$0xff] }
   0x9   :  { %1050 = vmatmul.mubr.msk.f32.vlgmr.msra.gmra.mrb[0].mxu1 %vm64_vm0, %v33_v8  ;;  %1138 = vmatprep.subr.bf16.mxu0 %v1137_v22  ;;  %v1145_v34 = vpack.c.bf16 %v236_v32, %v233_v31  ;;  %v232_v35 = vld [vmem:[%s2444_s3 + $0x90] sm:$0xff]  ;;  %v239_v37 = vld [vmem:[%s2444_s3 + $0xc8] sm:$0xff]  ;;  %v242_v38 = vld [vmem:[%s2444_s3 + $0xe0] sm:$0xff] }
   0xa   :  { %1132 = vmatpush1.bf16.msra.mxu1 %v1131_v16  ;;  %203 = vmatprep.mubr.f32.mxu1 %v1455_v5  ;;  %v264_v39 = vld [vmem:[%s2444_s3 + $0x190] sm:$0xff]  ;;  %v267_v40 = vld [vmem:[%s2444_s3 + $0x1a8] sm:$0xff]  ;;  %v1147_v41 = vpack.c.bf16 %v235_v36, %v232_v35  ;;  %v238_v42 = vld [vmem:[%s2444_s3 + $0xc0] sm:$0xff]  ;;  %v1149_v45 = vpack.c.bf16 %v242_v38, %v239_v37 }
   0xb   :  { %v1261_v43 = vpack.c.bf16 %v267_v40, %v264_v39  ;;  %v216_v44 = vld [vmem:[%s2444_s3 + $0x10] sm:$0xff]  ;;  %v241_v46 = vld [vmem:[%s2444_s3 + $0xd8] sm:$0xff]  ;;  %v219_v48 = vld [vmem:[%s2444_s3 + $0x28] sm:$0xff] }
   0xc   :  { %1140 = vmatpush1.bf16.msra.mxu0 %v1139_v27  ;;  %v245_v47 = vld [vmem:[%s2444_s3 + $0xf8] sm:$0xff]  ;;  %v248_v49 = vld [vmem:[%s2444_s3 + $0x110] sm:$0xff]  ;;  %v1263_v50 = vpack.c.bf16 %v219_v48, %v216_v44  ;;  %v270_v51 = vld [vmem:[%s2444_s3 + $0x1c0] sm:$0xff]  ;;  %v1151_v56 = vpack.c.bf16 %v241_v46, %v238_v42 }
   0xd   :  { %1051 = vmatmul.mubr.msk.f32.vlgmr.msra.gmra.mrb[2].mxu1 %vm64_vm0, %v33_v8  ;;  %1142 = vmatprep.subr.bf16.mxu0 %v1141_v28  ;;  %v273_v52 = vld [vmem:[%s2444_s3 + $0x1d8] sm:$0xff]  ;;  %v222_v54 = vld [vmem:[%s2444_s3 + $0x40] sm:$0xff]  ;;  %v244_v57 = vld [vmem:[%s2444_s3 + $0xf0] sm:$0xff]  ;;  %v1153_v60 = vpack.c.bf16 %v248_v49, %v245_v47 }
   0xe   :  { %1262 = vmatprep.subr.bf16.mxu1 %v1261_v43  ;;  %v1265_v53 = vpack.c.bf16 %v273_v52, %v270_v51  ;;  %v225_v55 = vld [vmem:[%s2444_s3 + $0x58] sm:$0xff]  ;;  %v276_v59 = vld [vmem:[%s2444_s3 + $0x1f0] sm:$0xff]  ;;  %v247_v61 = vld [vmem:[%s2444_s3 + $0x108] sm:$0xff] }
   0xf   :  { %1264 = vmatpush3.bf16.msra.mxu1 %v1263_v50  ;;  %v1267_v58 = vpack.c.bf16 %v225_v55, %v222_v54  ;;  %v251_v62 = vld [vmem:[%s2444_s3 + $0x128] sm:$0xff]  ;;  %v254_v0 = vld [vmem:[%s2444_s3 + $0x140] sm:$0xff]  ;;  %v228_v2 = vld [vmem:[%s2444_s3 + $0x70] sm:$0xff]  ;;  %v1155_v7 = vpack.c.bf16 %v247_v61, %v244_v57 }
  0x10   :  { %1144 = vmatpush1.bf16.msra.mxu0 %v1143_v33  ;;  %1266 = vmatprep.subr.bf16.mxu1 %v1265_v53  ;;  %v279_v63 = vld [vmem:[%s2444_s3 + $0x208] sm:$0xff]  ;;  %v282_v4 = vld [vmem:[%s2444_s3 + $0x220] sm:$0xff]  ;;  %v285_v6 = vld [vmem:[%s2444_s3 + $0x238] sm:$0xff]  ;;  %v1157_v11 = vpack.c.bf16 %v254_v0, %v251_v62 }
  0x11   :  { %1146 = vmatprep.subr.bf16.mxu0 %v1145_v34  ;;  %v1269_v1 = vpack.c.bf16 %v279_v63, %v276_v59  ;;  %v231_v3 = vld [vmem:[%s2444_s3 + $0x88] sm:$0xff]  ;;  %v250_v8 = vld [vmem:[%s2444_s3 + $0x120] sm:$0xff]  ;;  %v253_v9 = vld [vmem:[%s2444_s3 + $0x138] sm:$0xff]  ;;  %v1273_v13 = vpack.c.bf16 %v285_v6, %v282_v4 }
  0x12   :  { %v1271_v10 = vpack.c.bf16 %v231_v3, %v228_v2  ;;  %v257_v12 = vld [vmem:[%s2444_s3 + $0x158] sm:$0xff]  ;;  %v234_v14 = vld [vmem:[%s2444_s3 + $0xa0] sm:$0xff]  ;;  %v260_v16 = vld [vmem:[%s2444_s3 + $0x170] sm:$0xff]  ;;  %v1159_v19 = vpack.c.bf16 %v253_v9, %v250_v8 }
  0x13   :  { %1268 = vmatpush3.bf16.msra.mxu1 %v1267_v58  ;;  %v237_v15 = vld [vmem:[%s2444_s3 + $0xb8] sm:$0xff]  ;;  %v288_v17 = vld [vmem:[%s2444_s3 + $0x250] sm:$0xff]  ;;  %v291_v18 = vld [vmem:[%s2444_s3 + $0x268] sm:$0xff]  ;;  %v1161_v23 = vpack.c.bf16 %v260_v16, %v257_v12 }
  0x14   :  { %1148 = vmatpush1.bf16.msra.mxu0 %v1147_v41  ;;  %1270 = vmatprep.subr.bf16.mxu1 %v1269_v1  ;;  %v256_v20 = vld [vmem:[%s2444_s3 + $0x150] sm:$0xff]  ;;  %v259_v21 = vld [vmem:[%s2444_s3 + $0x168] sm:$0xff]  ;;  %v1275_v22 = vpack.c.bf16 %v237_v15, %v234_v14  ;;  %v1277_v25 = vpack.c.bf16 %v291_v18, %v288_v17  ;;  %v266_v28 = vld [vmem:[%s2444_s3 + $0x1a0] sm:$0xff] }
  0x15   :  { %1150 = vmatprep.subr.bf16.mxu0 %v1149_v45  ;;  %v263_v24 = vld [vmem:[%s2444_s3 + $0x188] sm:$0xff]  ;;  %v240_v26 = vld [vmem:[%s2444_s3 + $0xd0] sm:$0xff]  ;;  %v294_v29 = vld [vmem:[%s2444_s3 + $0x280] sm:$0xff]  ;;  %v1163_v31 = vpack.c.bf16 %v259_v21, %v256_v20 }
  0x16   :  { %v243_v27 = vld [vmem:[%s2444_s3 + $0xe8] sm:$0xff]  ;;  %v297_v30 = vld [vmem:[%s2444_s3 + $0x298] sm:$0xff]  ;;  %v262_v32 = vld [vmem:[%s2444_s3 + $0x180] sm:$0xff]  ;;  %v1165_v36 = vpack.c.bf16 %v266_v28, %v263_v24 }
  0x17   :  { %1272 = vmatpush3.bf16.msra.mxu1 %v1271_v10  ;;  %v265_v33 = vld [vmem:[%s2444_s3 + $0x198] sm:$0xff]  ;;  %v1279_v35 = vpack.c.bf16 %v243_v27, %v240_v26  ;;  %v1281_v37 = vpack.c.bf16 %v297_v30, %v294_v29  ;;  %v246_v38 = vld [vmem:[%s2444_s3 + $0x100] sm:$0xff] }
  0x18   :  { %1152 = vmatpush1.bf16.msra.mxu0 %v1151_v56  ;;  %1274 = vmatprep.subr.bf16.mxu1 %v1273_v13  ;;  %v269_v34 = vld [vmem:[%s2444_s3 + $0x1b8] sm:$0xff] }
  0x19   :  { %1154 = vmatprep.subr.bf16.mxu0 %v1153_v60  ;;  %v249_v39 = vld [vmem:[%s2444_s3 + $0x118] sm:$0xff] }
  0x1b   :  { %1276 = vmatpush3.bf16.msra.mxu1 %v1275_v22 }
  0x1c   :  { %1156 = vmatpush1.bf16.msra.mxu0 %v1155_v7  ;;  %1278 = vmatprep.subr.bf16.mxu1 %v1277_v25 }
  0x1d   :  { %1158 = vmatprep.subr.bf16.mxu0 %v1157_v11 }
  0x20   :  { %1160 = vmatpush1.bf16.msra.mxu0 %v1159_v19 }
  0x21   :  { %1162 = vmatprep.subr.bf16.mxu0 %v1161_v23 }
  0x22   :  { %14 = vsyncpa [#allocation3], 0  ;;  %v272_v40 = vld [vmem:[%s2444_s3 + $0x1d0] sm:$0xff]  ;;  %v303_v42 = vld [vmem:[%s2444_s3 + $0x2c8] sm:$0xff]  ;;  %v1167_v43 = vpack.c.bf16 %v265_v33, %v262_v32  ;;  %1280 = vmatpush3.bf16.msra.mxu1 %v1279_v35  ;;  %v1283_v45 = vpack.c.bf16 %v249_v39, %v246_v38  ;;  %v44_v38 = vlaneseq  ;;  %s1457_s14 = smov [#allocation2]   ;;  %vm1034_vm1 = vcmask 306176  }
  0x23   :  { %v300_v41 = vld [vmem:[%s2444_s3 + $0x2b0] sm:$0xff]  ;;  %v1169_v46 = vpack.c.bf16 %v272_v40, %v269_v34  ;;  %v271_v47 = vld [vmem:[%s2444_s3 + $0x1c8] sm:$0xff]  ;;  %1282 = vmatprep.subr.bf16.mxu1 %v1281_v37  ;;  %v278_v52 = vld [vmem:[%s2444_s3 + $0x200] sm:$0xff] }
  0x24   :  { %1164 = vmatpush1.bf16.msra.mxu0 %v1163_v31  ;;  %v268_v44 = vld [vmem:[%s2444_s3 + $0x1b0] sm:$0xff]  ;;  %v1285_v48 = vpack.c.bf16 %v303_v42, %v300_v41  ;;  %v255_v50 = vld [vmem:[%s2444_s3 + $0x148] sm:$0xff]  ;;  %v274_v56 = vld [vmem:[%s2444_s3 + $0x1e0] sm:$0xff]  ;;  %v1839_v39 = vshrl.u32 %v44_v38, 7 }
  0x25   :  { %1166 = vmatprep.subr.bf16.mxu0 %v1165_v36  ;;  %v252_v49 = vld [vmem:[%s2444_s3 + $0x130] sm:$0xff]  ;;  %v275_v51 = vld [vmem:[%s2444_s3 + $0x1e8] sm:$0xff]  ;;  %v1171_v53 = vpack.c.bf16 %v271_v47, %v268_v44  ;;  %v277_v57 = vld [vmem:[%s2444_s3 + $0x1f8] sm:$0xff] }
  0x26   :  { %1284 = vmatpush3.bf16.msra.mxu1 %v1283_v45  ;;  %v1287_v54 = vpack.c.bf16 %v255_v50, %v252_v49  ;;  %v1173_v55 = vpack.c.bf16 %v278_v52, %v275_v51  ;;  %v281_v58 = vld [vmem:[%s2444_s3 + $0x218] sm:$0xff]  ;;  %v284_v59 = vld [vmem:[%s2444_s3 + $0x230] sm:$0xff]  ;;  %v1175_v60 = vpack.c.bf16 %v277_v57, %v274_v56  ;;  %v283_v63 = vld [vmem:[%s2444_s3 + $0x228] sm:$0xff]  ;;  %v1842_v40 = vsub.s32 0, %v1839_v39 }
  0x27   :  { %1286 = vmatprep.subr.bf16.mxu1 %v1285_v48  ;;  %v1177_v61 = vpack.c.bf16 %v284_v59, %v281_v58  ;;  %v280_v62 = vld [vmem:[%s2444_s3 + $0x210] sm:$0xff]  ;;  %v287_v0 = vld [vmem:[%s2444_s3 + $0x248] sm:$0xff]  ;;  %v290_v1 = vld [vmem:[%s2444_s3 + $0x260] sm:$0xff]  ;;  %v1850_v42 = vsub.s32 1, %v1839_v39  ;;  %v58_v45 = vsub.s32 3, %v1839_v39 }
  0x28   :  { %1168 = vmatpush1.bf16.msra.mxu0 %v1167_v43  ;;  %v1179_v2 = vpack.c.bf16 %v283_v63, %v280_v62  ;;  %v1181_v3 = vpack.c.bf16 %v290_v1, %v287_v0  ;;  %v286_v4 = vld [vmem:[%s2444_s3 + $0x240] sm:$0xff]  ;;  %v289_v6 = vld [vmem:[%s2444_s3 + $0x258] sm:$0xff]  ;;  %v296_v8 = vld [vmem:[%s2444_s3 + $0x290] sm:$0xff] }
  0x29   :  { %1170 = vmatprep.subr.bf16.mxu0 %v1169_v46  ;;  %v293_v7 = vld [vmem:[%s2444_s3 + $0x278] sm:$0xff]  ;;  %v1183_v9 = vpack.c.bf16 %v289_v6, %v286_v4  ;;  %v292_v11 = vld [vmem:[%s2444_s3 + $0x270] sm:$0xff]  ;;  %v295_v12 = vld [vmem:[%s2444_s3 + $0x288] sm:$0xff] }
  0x2a   :  { %1288 = vmatpush3.bf16.msra.mxu1 %v1287_v54  ;;  %v1185_v10 = vpack.c.bf16 %v296_v8, %v293_v7  ;;  %v299_v13 = vld [vmem:[%s2444_s3 + $0x2a8] sm:$0xff]  ;;  %v302_v14 = vld [vmem:[%s2444_s3 + $0x2c0] sm:$0xff]  ;;  %v1187_v15 = vpack.c.bf16 %v295_v12, %v292_v11  ;;  %v301_v18 = vld [vmem:[%s2444_s3 + $0x2b8] sm:$0xff] }
  0x2b   :  { %v1189_v16 = vpack.c.bf16 %v302_v14, %v299_v13  ;;  %v298_v17 = vld [vmem:[%s2444_s3 + $0x2a0] sm:$0xff]  ;;  %v305_v20 = vld [vmem:[%s2444_s3 + $0x2d8] sm:$0xff]  ;;  %v308_v21 = vld [vmem:[%s2444_s3 + $0x2f0] sm:$0xff] }
  0x2c   :  { %1172 = vmatpush1.bf16.msra.mxu0 %v1171_v53  ;;  %v1191_v19 = vpack.c.bf16 %v301_v18, %v298_v17  ;;  %v306_v22 = vld [vmem:[%s2444_s3 + $0x2e0] sm:$0xff]  ;;  %v1193_v23 = vpack.c.bf16 %v308_v21, %v305_v20  ;;  %v309_v24 = vld [vmem:[%s2444_s3 + $0x2f8] sm:$0xff]  ;;  %v304_v25 = vld [vmem:[%s2444_s3 + $0x2d0] sm:$0xff] }
  0x2d   :  { %1174 = vmatprep.subr.bf16.mxu0 %v1173_v55  ;;  %v307_v26 = vld [vmem:[%s2444_s3 + $0x2e8] sm:$0xff]  ;;  %v1289_v27 = vpack.c.bf16 %v309_v24, %v306_v22  ;;  %v258_v29 = vld [vmem:[%s2444_s3 + $0x160] sm:$0xff]  ;;  %v261_v30 = vld [vmem:[%s2444_s3 + $0x178] sm:$0xff] }
  0x2e   :  { %v1195_v28 = vpack.c.bf16 %v307_v26, %v304_v25  ;;  %v1291_v31 = vpack.c.bf16 %v261_v30, %v258_v29  ;;  %v311_v32 = vld [vmem:[%s2444_s3 + $0x308] sm:$0xff]  ;;  %v314_v33 = vld [vmem:[%s2444_s3 + $0x320] sm:$0xff]  ;;  %v360_v34 = vld [vmem:[%s2444_s3 + $0x490] sm:$0xff] }
  0x2f   :  { %1290 = vmatprep.subr.bf16.mxu1 %v1289_v27  ;;  %v1197_v35 = vpack.c.bf16 %v314_v33, %v311_v32  ;;  %v363_v36 = vld [vmem:[%s2444_s3 + $0x4a8] sm:$0xff]  ;;  %v1847_v41 = vld [vmem:[%s2443_s2] sm:$0xf]  ;;  %v313_v48 = vld [vmem:[%s2444_s3 + $0x318] sm:$0xff] }
  0x30   :  { %1176 = vmatpush1.bf16.msra.mxu0 %v1175_v60  ;;  %1292 = vmatpush3.bf16.msra.mxu1 %v1291_v31  ;;  %v1293_v37 = vpack.c.bf16 %v363_v36, %v360_v34  ;;  %v47_v43 = vrot.slane %v1847_v41, %v1842_v40  ;;  %v51_v44 = vrot.slane %v1847_v41, %v1850_v42  ;;  %v310_v47 = vld [vmem:[%s2444_s3 + $0x300] sm:$0xff]  ;;  %v312_v51 = vld [vmem:[%s2444_s3 + $0x310] sm:$0xff]  ;;  %v315_v52 = vld [vmem:[%s2444_s3 + $0x328] sm:$0xff] }
  0x31   :  { %1178 = vmatprep.subr.bf16.mxu0 %v1177_v61  ;;  %v317_v53 = vld [vmem:[%s2444_s3 + $0x338] sm:$0xff]  ;;  %v320_v55 = vld [vmem:[%s2444_s3 + $0x350] sm:$0xff]  ;;  %v366_v56 = vld [vmem:[%s2444_s3 + $0x4c0] sm:$0xff]  ;;  %v59_v58 = vrot.slane %v1847_v41, %v58_v45  ;;  %v1199_v60 = vpack.c.bf16 %v313_v48, %v310_v47  ;;  %v1295_v61 = vpack.c.bf16 %v315_v52, %v312_v51 }
  0x32   :  { %1294 = vmatprep.subr.bf16.mxu1 %v1293_v37  ;;  %v369_v57 = vld [vmem:[%s2444_s3 + $0x4d8] sm:$0xff]  ;;  %v316_v62 = vld [vmem:[%s2444_s3 + $0x330] sm:$0xff]  ;;  %v319_v63 = vld [vmem:[%s2444_s3 + $0x348] sm:$0xff] }
  0x33   :  { %v318_v4 = vld [vmem:[%s2444_s3 + $0x340] sm:$0xff]  ;;  %v321_v6 = vld [vmem:[%s2444_s3 + $0x358] sm:$0xff]  ;;  %v323_v7 = vld [vmem:[%s2444_s3 + $0x368] sm:$0xff]  ;;  %v1203_v13 = vpack.c.bf16 %v319_v63, %v316_v62 }
  0x34   :  { %1180 = vmatpush1.bf16.msra.mxu0 %v1179_v2  ;;  %v1201_v2 = vpack.c.bf16 %v320_v55, %v317_v53  ;;  %v375_v11 = vld [vmem:[%s2444_s3 + $0x508] sm:$0xff]  ;;  %v1299_v14 = vpack.c.bf16 %v321_v6, %v318_v4  ;;  %v324_v20 = vld [vmem:[%s2444_s3 + $0x370] sm:$0xff]  ;;  %v329_v22 = vld [vmem:[%s2444_s3 + $0x398] sm:$0xff] }
  0x35   :  { %1182 = vmatprep.subr.bf16.mxu0 %v1181_v3  ;;  %v1297_v3 = vpack.c.bf16 %v369_v57, %v366_v56  ;;  %v327_v21 = vld [vmem:[%s2444_s3 + $0x388] sm:$0xff]  ;;  %v378_v24 = vld [vmem:[%s2444_s3 + $0x520] sm:$0xff]  ;;  %v381_v25 = vld [vmem:[%s2444_s3 + $0x538] sm:$0xff] }
  0x36   :  { %v1303_v27 = vpack.c.bf16 %v327_v21, %v324_v20  ;;  %v331_v29 = vld [vmem:[%s2444_s3 + $0x3a8] sm:$0xff]  ;;  %v1305_v31 = vpack.c.bf16 %v381_v25, %v378_v24  ;;  %v330_v32 = vld [vmem:[%s2444_s3 + $0x3a0] sm:$0xff]  ;;  %v333_v33 = vld [vmem:[%s2444_s3 + $0x3b8] sm:$0xff] }
  0x37   :  { %v335_v34 = vld [vmem:[%s2444_s3 + $0x3c8] sm:$0xff]  ;;  %v384_v36 = vld [vmem:[%s2444_s3 + $0x550] sm:$0xff]  ;;  %v337_v45 = vld [vmem:[%s2444_s3 + $0x3d8] sm:$0xff] }
  0x38   :  { %1184 = vmatpush1.bf16.msra.mxu0 %v1183_v9  ;;  %v326_v9 = vld [vmem:[%s2444_s3 + $0x380] sm:$0xff]  ;;  %v387_v37 = vld [vmem:[%s2444_s3 + $0x568] sm:$0xff]  ;;  %v336_v48 = vld [vmem:[%s2444_s3 + $0x3d0] sm:$0xff] }
  0x39   :  { %1186 = vmatprep.subr.bf16.mxu0 %v1185_v10  ;;  %v372_v10 = vld [vmem:[%s2444_s3 + $0x4f0] sm:$0xff]  ;;  %v1205_v18 = vpack.c.bf16 %v326_v9, %v323_v7  ;;  %v1309_v47 = vpack.c.bf16 %v387_v37, %v384_v36  ;;  %v390_v52 = vld [vmem:[%s2444_s3 + $0x580] sm:$0xff]  ;;  %v393_v53 = vld [vmem:[%s2444_s3 + $0x598] sm:$0xff] }
  0x3a   :  { %v344_v51 = vld [vmem:[%s2444_s3 + $0x410] sm:$0xff]  ;;  %v343_v57 = vld [vmem:[%s2444_s3 + $0x408] sm:$0xff]  ;;  %v350_v63 = vld [vmem:[%s2444_s3 + $0x440] sm:$0xff] }
  0x3b   :  { %v340_v56 = vld [vmem:[%s2444_s3 + $0x3f0] sm:$0xff]  ;;  %v347_v62 = vld [vmem:[%s2444_s3 + $0x428] sm:$0xff]  ;;  %v346_v7 = vld [vmem:[%s2444_s3 + $0x420] sm:$0xff] }
  0x3c   :  { %1188 = vmatpush1.bf16.msra.mxu0 %v1187_v15  ;;  %v322_v15 = vld [vmem:[%s2444_s3 + $0x360] sm:$0xff]  ;;  %v1219_v4 = vpack.c.bf16 %v343_v57, %v340_v56  ;;  %v1221_v9 = vpack.c.bf16 %v350_v63, %v347_v62  ;;  %v352_v20 = vld [vmem:[%s2444_s3 + $0x450] sm:$0xff]  ;;  %v357_v24 = vld [vmem:[%s2444_s3 + $0x478] sm:$0xff] }
  0x3d   :  { %1190 = vmatprep.subr.bf16.mxu0 %v1189_v16  ;;  %v325_v16 = vld [vmem:[%s2444_s3 + $0x378] sm:$0xff]  ;;  %v359_v25 = vld [vmem:[%s2444_s3 + $0x488] sm:$0xff]  ;;  %v364_v37 = vld [vmem:[%s2444_s3 + $0x4b0] sm:$0xff] }
  0x3e   :  { %v1207_v26 = vpack.c.bf16 %v325_v16, %v322_v15  ;;  %v402_v15 = vld [vmem:[%s2444_s3 + $0x5e0] sm:$0xff]  ;;  %v405_v16 = vld [vmem:[%s2444_s3 + $0x5f8] sm:$0xff]  ;;  %v392_v62 = vld [vmem:[%s2444_s3 + $0x590] sm:$0xff] }
  0x3f   :  { %v386_v56 = vld [vmem:[%s2444_s3 + $0x560] sm:$0xff] }
  0x40   :  { %1192 = vmatpush1.bf16.msra.mxu0 %v1191_v19  ;;  %v1301_v19 = vpack.c.bf16 %v375_v11, %v372_v10  ;;  %v348_v11 = vld [vmem:[%s2444_s3 + $0x430] sm:$0xff] }
  0x41   :  { %1194 = vmatprep.subr.bf16.mxu0 %v1193_v23  ;;  %v332_v23 = vld [vmem:[%s2444_s3 + $0x3b0] sm:$0xff] }
  0x42   :  { %v1209_v30 = vpack.c.bf16 %v332_v23, %v329_v22  ;;  %v1321_v22 = vpack.c.bf16 %v405_v16, %v402_v15  ;;  %v355_v23 = vld [vmem:[%s2444_s3 + $0x468] sm:$0xff]  ;;  %v400_v16 = vld [vmem:[%s2444_s3 + $0x5d0] sm:$0xff] }
  0x44   :  { %1196 = vmatpush1.bf16.msra.mxu0 %v1195_v28  ;;  %v328_v28 = vld [vmem:[%s2444_s3 + $0x390] sm:$0xff] }
  0x45   :  { %1198 = vmatprep.subr.bf16.mxu0 %v1197_v35  ;;  %v338_v35 = vld [vmem:[%s2444_s3 + $0x3e0] sm:$0xff]  ;;  %v1211_v38 = vpack.c.bf16 %v331_v29, %v328_v28  ;;  %v1227_v28 = vpack.c.bf16 %v355_v23, %v352_v20  ;;  %v711_v20 = vld [vmem:[%s2446_s5 + $0x18] sm:$0xff]  ;;  %v710_v23 = vld [vmem:[%s2446_s5 + $0x10] sm:$0xff] }
  0xdc   :  { %v134_v46 = vpop.f32.mrb[0].mxu1 }
  0xdd   :  { %v135_v49 = vadd.f32 %v134_v46, %v47_v43  ;;  %v136_v50 = vpop.f32.mrb[1].mxu1  ;;  %v1307_v43 = vpack.c.bf16 %v333_v33, %v330_v32  ;;  %v1213_v46 = vpack.c.bf16 %v338_v35, %v335_v34  ;;  %v361_v32 = vld [vmem:[%s2444_s3 + $0x498] sm:$0xff]  ;;  %v368_v33 = vld [vmem:[%s2444_s3 + $0x4d0] sm:$0xff] }
  0xde   :  { %v137_v54 = vadd.f32 %v136_v50, %v51_v44  ;;  %v334_v44 = vld [vmem:[%s2444_s3 + $0x3c0] sm:$0xff]  ;;  %v341_v50 = vld [vmem:[%s2444_s3 + $0x3f8] sm:$0xff] }
  0xdf   :  { %v210_v1 = vmax.f32 %v135_v49, 0.0  ;;  %v339_v49 = vld [vmem:[%s2444_s3 + $0x3e8] sm:$0xff] }
  0xe0   :  { %v211_v59 = vmax.f32 %v137_v54, 0.0  ;;  %v1888_v0 = vpop.f32.mrb[2].mxu1  ;;  %v1215_v54 = vpack.c.bf16 %v337_v45, %v334_v44  ;;  %v1311_v55 = vpack.c.bf16 %v339_v49, %v336_v48  ;;  %v374_v44 = vld [vmem:[%s2444_s3 + $0x500] sm:$0xff]  ;;  %v373_v48 = vld [vmem:[%s2444_s3 + $0x4f8] sm:$0xff] }
  0xe1   :  { %v207_v8 = vpop.f32.mrb[3].mxu1  ;;  %v377_v49 = vld [vmem:[%s2444_s3 + $0x518] sm:$0xff] }
  0xe2   :  { %487 = vmatprep.mubr.f32.mxu0 %v211_v59  ;;  %629 = vmatprep.mubr.f32.mxu1 %v211_v59  ;;  %v208_v12 = vadd.f32 %v207_v8, %v59_v58  ;;  %v1217_v58 = vpack.c.bf16 %v344_v51, %v341_v50  ;;  %v1313_v59 = vpack.c.bf16 %v393_v53, %v390_v52  ;;  %v349_v8 = vld [vmem:[%s2444_s3 + $0x438] sm:$0xff]  ;;  %v380_v50 = vld [vmem:[%s2444_s3 + $0x530] sm:$0xff] }
  0xe3   :  { %488 = vmatmul.mubr.f32.vlgmr.msra.gmra.mrb[0].mxu0 %v210_v1  ;;  %630 = vmatmul.mubr.f32.vlgmr.msra.gmra.mrb[4].mxu1 %v210_v1  ;;  %v396_v1 = vld [vmem:[%s2444_s3 + $0x5b0] sm:$0xff]  ;;  %v1241_v52 = vpack.c.bf16 %v380_v50, %v377_v49  ;;  %v729_v50 = vld [vmem:[%s2446_s5 + $0xa8] sm:$0xff] }
  0xe4   :  { %1200 = vmatpush1.bf16.msra.mxu0 %v1199_v60  ;;  %1296 = vmatpush3.bf16.msra.mxu1 %v1295_v61  ;;  %v213_v17 = vmax.f32 %v208_v12, 0.0  ;;  %v342_v60 = vld [vmem:[%s2444_s3 + $0x400] sm:$0xff]  ;;  %v345_v61 = vld [vmem:[%s2444_s3 + $0x418] sm:$0xff]  ;;  %v351_v12 = vld [vmem:[%s2444_s3 + $0x448] sm:$0xff] }
  0xe5   :  { %1202 = vmatprep.subr.bf16.mxu0 %v1201_v2  ;;  %1298 = vmatprep.subr.bf16.mxu1 %v1297_v3  ;;  %v399_v2 = vld [vmem:[%s2444_s3 + $0x5c8] sm:$0xff]  ;;  %v54_v3 = vsub.s32 2, %v1839_v39  ;;  %v1315_v6 = vpack.c.bf16 %v345_v61, %v342_v60  ;;  %v376_v53 = vld [vmem:[%s2444_s3 + $0x510] sm:$0xff]  ;;  %v385_v60 = vld [vmem:[%s2444_s3 + $0x558] sm:$0xff] }
  0xe6   :  { %699 = vmatprep.mubr.f32.mxu1 %v213_v17  ;;  %558 = vmatprep.mubr.f32.mxu0 %v213_v17  ;;  %v1317_v10 = vpack.c.bf16 %v399_v2, %v396_v1  ;;  %v389_v61 = vld [vmem:[%s2444_s3 + $0x578] sm:$0xff]  ;;  %v388_v2 = vld [vmem:[%s2444_s3 + $0x570] sm:$0xff] }
  0xe7   :  { %v55_v17 = vrot.slane %v1847_v41, %v54_v3  ;;  %v354_v41 = vld [vmem:[%s2444_s3 + $0x460] sm:$0xff]  ;;  %v1249_v1 = vpack.c.bf16 %v392_v62, %v389_v61  ;;  %v726_v49 = vld [vmem:[%s2446_s5 + $0x90] sm:$0xff] }
  0xe8   :  { %1204 = vmatpush1.bf16.msra.mxu0 %v1203_v13  ;;  %1300 = vmatpush3.bf16.msra.mxu1 %v1299_v14  ;;  %v353_v13 = vld [vmem:[%s2444_s3 + $0x458] sm:$0xff]  ;;  %v356_v14 = vld [vmem:[%s2444_s3 + $0x470] sm:$0xff]  ;;  %v1323_v29 = vpack.c.bf16 %v357_v24, %v354_v41  ;;  %v713_v41 = vld [vmem:[%s2446_s5 + $0x28] sm:$0xff] }
  0xe9   :  { %1206 = vmatprep.subr.bf16.mxu0 %v1205_v18  ;;  %1302 = vmatprep.subr.bf16.mxu1 %v1301_v19  ;;  %v1223_v18 = vpack.c.bf16 %v349_v8, %v346_v7  ;;  %v1319_v19 = vpack.c.bf16 %v351_v12, %v348_v11  ;;  %v1225_v21 = vpack.c.bf16 %v356_v14, %v353_v13  ;;  %v398_v7 = vld [vmem:[%s2444_s3 + $0x5c0] sm:$0xff]  ;;  %v397_v11 = vld [vmem:[%s2444_s3 + $0x5b8] sm:$0xff]  ;;  %v404_v13 = vld [vmem:[%s2444_s3 + $0x5f0] sm:$0xff] }
  0xea   :  { %v401_v12 = vld [vmem:[%s2444_s3 + $0x5d8] sm:$0xff]  ;;  %v734_v61 = vld [vmem:[%s2446_s5 + $0xd0] sm:$0xff] }
  0xeb   :  { %v1257_v15 = vpack.c.bf16 %v404_v13, %v401_v12  ;;  %v715_v24 = vld [vmem:[%s2446_s5 + $0x38] sm:$0xff]  ;;  %v742_v12 = vld [vmem:[%s2446_s5 + $0x110] sm:$0xff] }
  0xec   :  { %1208 = vmatpush1.bf16.msra.mxu0 %v1207_v26  ;;  %1304 = vmatpush3.bf16.msra.mxu1 %v1303_v27  ;;  %v362_v26 = vld [vmem:[%s2444_s3 + $0x4a0] sm:$0xff]  ;;  %v2051_v27 = vadd.f32 %v1888_v0, %v55_v17  ;;  %v365_v0 = vld [vmem:[%s2444_s3 + $0x4b8] sm:$0xff]  ;;  %v403_v17 = vld [vmem:[%s2444_s3 + $0x5e8] sm:$0xff] }
  0xed   :  { %1210 = vmatprep.subr.bf16.mxu0 %v1209_v30  ;;  %1306 = vmatprep.subr.bf16.mxu1 %v1305_v31  ;;  %v1229_v30 = vpack.c.bf16 %v362_v26, %v359_v25  ;;  %v358_v31 = vld [vmem:[%s2444_s3 + $0x480] sm:$0xff]  ;;  %v1233_v36 = vpack.c.bf16 %v368_v33, %v365_v0  ;;  %v1329_v26 = vpack.c.bf16 %v715_v24, %v713_v41  ;;  %v718_v33 = vld [vmem:[%s2446_s5 + $0x50] sm:$0xff]  ;;  %v753_v24 = vld [vmem:[%s2446_s5 + $0x168] sm:$0xff] }
  0xee   :  { %v212_v34 = vmax.f32 %v2051_v27, 0.0  ;;  %v1231_v35 = vpack.c.bf16 %v361_v32, %v358_v31  ;;  %v712_v27 = vld [vmem:[%s2446_s5 + $0x20] sm:$0xff]  ;;  %v750_v41 = vld [vmem:[%s2446_s5 + $0x150] sm:$0xff] }
  0xef   :  { %v716_v0 = vld [vmem:[%s2446_s5 + $0x40] sm:$0xff]  ;;  %v774_v39 = vld [vmem:[%s2446_s5 + $0x210] sm:$0xff] }
  0xf0   :  { %1212 = vmatpush1.bf16.msra.mxu0 %v1211_v38  ;;  %1308 = vmatpush3.bf16.msra.mxu1 %v1307_v43  ;;  %v367_v38 = vld [vmem:[%s2444_s3 + $0x4c8] sm:$0xff] }
  0xf1   :  { %1214 = vmatprep.subr.bf16.mxu0 %v1213_v46  ;;  %1310 = vmatprep.subr.bf16.mxu1 %v1309_v47  ;;  %v371_v43 = vld [vmem:[%s2444_s3 + $0x4e8] sm:$0xff]  ;;  %v1235_v45 = vpack.c.bf16 %v367_v38, %v364_v37  ;;  %v370_v47 = vld [vmem:[%s2444_s3 + $0x4e0] sm:$0xff] }
  0xf2   :  { %v1237_v46 = vpack.c.bf16 %v374_v44, %v371_v43  ;;  %v1239_v51 = vpack.c.bf16 %v373_v48, %v370_v47  ;;  %v720_v38 = vld [vmem:[%s2446_s5 + $0x60] sm:$0xff]  ;;  %v722_v43 = vld [vmem:[%s2446_s5 + $0x70] sm:$0xff]  ;;  %v725_v44 = vld [vmem:[%s2446_s5 + $0x88] sm:$0xff] }
  0xf3   :  { %v724_v48 = vld [vmem:[%s2446_s5 + $0x80] sm:$0xff] }
  0xf4   :  { %1216 = vmatpush1.bf16.msra.mxu0 %v1215_v54  ;;  %1312 = vmatpush3.bf16.msra.mxu1 %v1311_v55  ;;  %v379_v54 = vld [vmem:[%s2444_s3 + $0x528] sm:$0xff] }
  0xf5   :  { %1218 = vmatprep.subr.bf16.mxu0 %v1217_v58  ;;  %1314 = vmatprep.subr.bf16.mxu1 %v1313_v59  ;;  %v383_v55 = vld [vmem:[%s2444_s3 + $0x548] sm:$0xff]  ;;  %v1243_v57 = vpack.c.bf16 %v379_v54, %v376_v53  ;;  %v382_v59 = vld [vmem:[%s2444_s3 + $0x540] sm:$0xff] }
  0xf6   :  { %v1245_v58 = vpack.c.bf16 %v386_v56, %v383_v55  ;;  %v1247_v63 = vpack.c.bf16 %v385_v60, %v382_v59  ;;  %v728_v54 = vld [vmem:[%s2446_s5 + $0xa0] sm:$0xff]  ;;  %v730_v55 = vld [vmem:[%s2446_s5 + $0xb0] sm:$0xff]  ;;  %v733_v56 = vld [vmem:[%s2446_s5 + $0xc8] sm:$0xff] }
  0xf7   :  { %v732_v60 = vld [vmem:[%s2446_s5 + $0xc0] sm:$0xff] }
  0xf8   :  { %1220 = vmatpush1.bf16.msra.mxu0 %v1219_v4  ;;  %1316 = vmatpush3.bf16.msra.mxu1 %v1315_v6  ;;  %v391_v4 = vld [vmem:[%s2444_s3 + $0x588] sm:$0xff]  ;;  %v1351_v62 = vpack.c.bf16 %v734_v61, %v732_v60  ;;  %v935_v61 = vld [vmem:[%s2448_s7] sm:$0xff] }
  0xf9   :  { %1222 = vmatprep.subr.bf16.mxu0 %v1221_v9  ;;  %1318 = vmatprep.subr.bf16.mxu1 %v1317_v10  ;;  %v395_v6 = vld [vmem:[%s2444_s3 + $0x5a8] sm:$0xff]  ;;  %v1251_v8 = vpack.c.bf16 %v391_v4, %v388_v2  ;;  %v394_v10 = vld [vmem:[%s2444_s3 + $0x5a0] sm:$0xff] }
  0xfa   :  { %v1253_v9 = vpack.c.bf16 %v398_v7, %v395_v6  ;;  %v1255_v14 = vpack.c.bf16 %v397_v11, %v394_v10  ;;  %v736_v4 = vld [vmem:[%s2446_s5 + $0xe0] sm:$0xff]  ;;  %v738_v6 = vld [vmem:[%s2446_s5 + $0xf0] sm:$0xff] }
  0xfb   :  { %v1355_v7 = vpack.c.bf16 %v738_v6, %v736_v4  ;;  %v740_v11 = vld [vmem:[%s2446_s5 + $0x100] sm:$0xff]  ;;  %v938_v4 = vld [vmem:[%s2448_s7 + $0x18] sm:$0xff] }
  0xfc   :  { %1224 = vmatpush1.bf16.msra.mxu0 %v1223_v18  ;;  %1320 = vmatpush3.bf16.msra.mxu1 %v1319_v19  ;;  %v1259_v18 = vpack.c.bf16 %v403_v17, %v400_v16  ;;  %v709_v19 = vld [vmem:[%s2446_s5 + $0x8] sm:$0xff]  ;;  %v1359_v13 = vpack.c.bf16 %v742_v12, %v740_v11  ;;  %v744_v16 = vld [vmem:[%s2446_s5 + $0x120] sm:$0xff]  ;;  %v942_v11 = vld [vmem:[%s2448_s7 + $0x38] sm:$0xff] }
  0xfd   :  { %1226 = vmatprep.subr.bf16.mxu0 %v1225_v21  ;;  %1322 = vmatprep.subr.bf16.mxu1 %v1321_v22  ;;  %v708_v21 = vld [vmem:[%s2446_s5] sm:$0xff]  ;;  %v1325_v22 = vpack.c.bf16 %v711_v20, %v709_v19  ;;  %v749_v19 = vld [vmem:[%s2446_s5 + $0x148] sm:$0xff]  ;;  %v751_v20 = vld [vmem:[%s2446_s5 + $0x158] sm:$0xff] }
  0xfe   :  { %v1327_v25 = vpack.c.bf16 %v710_v23, %v708_v21  ;;  %v748_v23 = vld [vmem:[%s2446_s5 + $0x140] sm:$0xff] }
 0x100   :  { %1228 = vmatpush1.bf16.msra.mxu0 %v1227_v28  ;;  %1324 = vmatpush3.bf16.msra.mxu1 %v1323_v29  ;;  %v714_v28 = vld [vmem:[%s2446_s5 + $0x30] sm:$0xff]  ;;  %v717_v29 = vld [vmem:[%s2446_s5 + $0x48] sm:$0xff] }
 0x101   :  { %1230 = vmatprep.subr.bf16.mxu0 %v1229_v30  ;;  %1326 = vmatprep.subr.bf16.mxu1 %v1325_v22  ;;  %v719_v30 = vld [vmem:[%s2446_s5 + $0x58] sm:$0xff]  ;;  %v1331_v31 = vpack.c.bf16 %v714_v28, %v712_v27  ;;  %v1365_v22 = vpack.c.bf16 %v751_v20, %v749_v19  ;;  %v752_v28 = vld [vmem:[%s2446_s5 + $0x160] sm:$0xff]  ;;  %v948_v20 = vld [vmem:[%s2448_s7 + $0x68] sm:$0xff] }
 0x102   :  { %v1333_v32 = vpack.c.bf16 %v719_v30, %v717_v29  ;;  %v754_v29 = vld [vmem:[%s2446_s5 + $0x170] sm:$0xff]  ;;  %v757_v30 = vld [vmem:[%s2446_s5 + $0x188] sm:$0xff]  ;;  %v947_v19 = vld [vmem:[%s2448_s7 + $0x60] sm:$0xff] }
 0x103   :  { %700 = vmatmul.mubr.f32.vlgmr.msra.gmra.mrb[6].mxu1 %v212_v34 }
 0x104   :  { %1232 = vmatpush1.bf16.msra.mxu0 %v1231_v35  ;;  %1328 = vmatpush1.bf16.msra.mxu1 %v1327_v25  ;;  %v723_v35 = vld [vmem:[%s2446_s5 + $0x78] sm:$0xff] }
 0x105   :  { %1234 = vmatprep.subr.bf16.mxu0 %v1233_v36  ;;  %1330 = vmatprep.subr.bf16.mxu1 %v1329_v26  ;;  %v1335_v36 = vpack.c.bf16 %v718_v33, %v716_v0  ;;  %v755_v25 = vld [vmem:[%s2446_s5 + $0x178] sm:$0xff]  ;;  %v1367_v26 = vpack.c.bf16 %v750_v41, %v748_v23  ;;  %v756_v33 = vld [vmem:[%s2446_s5 + $0x180] sm:$0xff] }
 0x106   :  { %v1369_v27 = vpack.c.bf16 %v755_v25, %v753_v24  ;;  %v406_v24 = vld [vmem:[%s2445_s4] sm:$0x7] }
 0x107   :  { %v419_v25 = vrot.slane %v406_v24, %v54_v3 }
 0x108   :  { %1236 = vmatpush1.bf16.msra.mxu0 %v1235_v45  ;;  %1332 = vmatpush1.bf16.msra.mxu1 %v1331_v31  ;;  %v727_v45 = vld [vmem:[%s2446_s5 + $0x98] sm:$0xff] }
 0x109   :  { %1238 = vmatprep.subr.bf16.mxu0 %v1237_v46  ;;  %1334 = vmatprep.subr.bf16.mxu1 %v1333_v32  ;;  %v1339_v46 = vpack.c.bf16 %v722_v43, %v720_v38  ;;  %v1341_v47 = vpack.c.bf16 %v727_v45, %v725_v44  ;;  %v759_v31 = vld [vmem:[%s2446_s5 + $0x198] sm:$0xff]  ;;  %v1371_v32 = vpack.c.bf16 %v754_v29, %v752_v28  ;;  %v760_v43 = vld [vmem:[%s2446_s5 + $0x1a0] sm:$0xff]  ;;  %v762_v44 = vld [vmem:[%s2446_s5 + $0x1b0] sm:$0xff] }
 0x10a   :  { %v1373_v0 = vpack.c.bf16 %v759_v31, %v757_v30  ;;  %v765_v45 = vld [vmem:[%s2446_s5 + $0x1c8] sm:$0xff]  ;;  %v411_v31 = vrot.slane %v406_v24, %v1842_v40 }
 0x10c   :  { %1240 = vmatpush1.bf16.msra.mxu0 %v1239_v51  ;;  %1336 = vmatpush1.bf16.msra.mxu1 %v1335_v36  ;;  %v731_v51 = vld [vmem:[%s2446_s5 + $0xb8] sm:$0xff] }
 0x10d   :  { %1242 = vmatprep.subr.bf16.mxu0 %v1241_v52  ;;  %v1343_v52 = vpack.c.bf16 %v726_v49, %v724_v48  ;;  %v1345_v53 = vpack.c.bf16 %v731_v51, %v729_v50  ;;  %v763_v36 = vld [vmem:[%s2446_s5 + $0x1b8] sm:$0xff]  ;;  %v764_v49 = vld [vmem:[%s2446_s5 + $0x1c0] sm:$0xff]  ;;  %v766_v50 = vld [vmem:[%s2446_s5 + $0x1d0] sm:$0xff] }
 0x10e   :  { %v1383_v51 = vpack.c.bf16 %v766_v50, %v764_v49  ;;  %v776_v49 = vld [vmem:[%s2447_s6] sm:$0x3]  ;;  %s1042_s6 = sshll.u32 %s1457_s14, 4  ;;  %s1043_s6 = int_to_ptr.vmem [resolvable:$true] %s1042_s6 }
 0x10f   :  { %v781_v50 = vrot.slane %v776_v49, %v1842_v40  ;;  %s1431_s15 = scalar_lea.vmem %s1043_s6, 64  ;;  %p1436_p1 = scmp.lt.s32.totalorder %s1043_s6, %s1043_s6 }
 0x110   :  { %1244 = vmatpush1.bf16.msra.mxu0 %v1243_v57  ;;  %v735_v57 = vld [vmem:[%s2446_s5 + $0xd8] sm:$0xff]  ;;  %p1432_p0 = scmp.ne.s32.totalorder %s1043_s6, %s1431_s15  ;;  %p1437_p2 = scmp.lt.s32.totalorder %s1431_s15, %s1431_s15 }
 0x111   :  { %1246 = vmatprep.subr.bf16.mxu0 %v1245_v58  ;;  %v1347_v58 = vpack.c.bf16 %v730_v55, %v728_v54  ;;  %v1349_v59 = vpack.c.bf16 %v735_v57, %v733_v56  ;;  %v768_v55 = vld [vmem:[%s2446_s5 + $0x1e0] sm:$0xff]  ;;  %v770_v56 = vld [vmem:[%s2446_s5 + $0x1f0] sm:$0xff] }
 0x112   :  { %v1387_v57 = vpack.c.bf16 %v770_v56, %v768_v55  ;;  %p1438_p3 = por %p1437_p2, %p1436_p1 }
 0x114   :  { %1248 = vmatpush1.bf16.msra.mxu0 %v1247_v63  ;;  %v737_v63 = vld [vmem:[%s2446_s5 + $0xe8] sm:$0xff]  ;;  %p1439_p4 = pnand %p1438_p3, %p1432_p0 }
 0x115   :  { %1250 = vmatprep.subr.bf16.mxu0 %v1249_v1  ;;  %v739_v1 = vld [vmem:[%s2446_s5 + $0xf8] sm:$0xff] }
 0x116   :  { %v1353_v2 = vpack.c.bf16 %v739_v1, %v737_v63  ;;  %v937_v63 = vld [vmem:[%s2448_s7 + $0x10] sm:$0xff]  ;;  %v1456_v1 = vmov 0.0|0.0  }
 0x117   :  { %v1397_v6 = vpack.c.bf16 %v938_v4, %v937_v63 }
 0x118   :  { %1252 = vmatpush1.bf16.msra.mxu0 %v1251_v8  ;;  %v741_v8 = vld [vmem:[%s2446_s5 + $0x108] sm:$0xff] }
 0x119   :  { %1254 = vmatprep.subr.bf16.mxu0 %v1253_v9  ;;  %v743_v9 = vld [vmem:[%s2446_s5 + $0x118] sm:$0xff] }
 0x11a   :  { %v1357_v10 = vpack.c.bf16 %v743_v9, %v741_v8  ;;  %v940_v8 = vld [vmem:[%s2448_s7 + $0x28] sm:$0xff] }
 0x11c   :  { %1256 = vmatpush1.bf16.msra.mxu0 %v1255_v14  ;;  %v745_v14 = vld [vmem:[%s2446_s5 + $0x128] sm:$0xff] }
 0x11d   :  { %1258 = vmatprep.subr.bf16.mxu0 %v1257_v15  ;;  %v747_v15 = vld [vmem:[%s2446_s5 + $0x138] sm:$0xff] }
 0x11e   :  { %v1361_v17 = vpack.c.bf16 %v747_v15, %v745_v14  ;;  %v944_v14 = vld [vmem:[%s2448_s7 + $0x48] sm:$0xff] }
 0x120   :  { %1260 = vmatpush1.bf16.msra.mxu0 %v1259_v18  ;;  %v746_v18 = vld [vmem:[%s2446_s5 + $0x130] sm:$0xff] }
 0x121   :  { %v1363_v21 = vpack.c.bf16 %v746_v18, %v744_v16  ;;  %1393 = vmatprep.subr.bf16.mxu0 %v1456_v1  ;;  %v945_v16 = vld [vmem:[%s2448_s7 + $0x50] sm:$0xff] }
 0x123   :  { %559 = vmatmul.mubr.f32.vlgmr.msra.gmra.mrb[0].mxu0 %v212_v34  ;;  %v721_v34 = vld [vmem:[%s2446_s5 + $0x68] sm:$0xff] }
 0x124   :  { %v1337_v37 = vpack.c.bf16 %v723_v35, %v721_v34  ;;  %v758_v34 = vld [vmem:[%s2446_s5 + $0x190] sm:$0xff]  ;;  %v761_v35 = vld [vmem:[%s2446_s5 + $0x1a8] sm:$0xff] }
 0x125   :  { %v1377_v38 = vpack.c.bf16 %v763_v36, %v761_v35  ;;  %v772_v35 = vld [vmem:[%s2446_s5 + $0x200] sm:$0xff] }
 0x126   :  { %1338 = vmatprep.subr.bf16.mxu1 %v1337_v37  ;;  %v1375_v37 = vpack.c.bf16 %v758_v34, %v756_v33 }
 0x127   :  { %1340 = vmatpush1.bf16.msra.mxu1 %v1339_v46  ;;  %v767_v46 = vld [vmem:[%s2446_s5 + $0x1d8] sm:$0xff] }
 0x128   :  { %1342 = vmatprep.subr.bf16.mxu1 %v1341_v47  ;;  %v1379_v47 = vpack.c.bf16 %v762_v44, %v760_v43  ;;  %v1381_v48 = vpack.c.bf16 %v767_v46, %v765_v45  ;;  %v949_v44 = vld [vmem:[%s2448_s7 + $0x70] sm:$0xff]  ;;  %v950_v45 = vld [vmem:[%s2448_s7 + $0x78] sm:$0xff] }
 0x129   :  { %v1415_v46 = vpack.c.bf16 %v950_v45, %v949_v44 }
 0x12b   :  { %1344 = vmatpush1.bf16.msra.mxu1 %v1343_v52  ;;  %v769_v52 = vld [vmem:[%s2446_s5 + $0x1e8] sm:$0xff] }
 0x12c   :  { %1346 = vmatprep.subr.bf16.mxu1 %v1345_v53  ;;  %v771_v53 = vld [vmem:[%s2446_s5 + $0x1f8] sm:$0xff] }
 0x12d   :  { %v1385_v54 = vpack.c.bf16 %v771_v53, %v769_v52 }
 0x12f   :  { %1348 = vmatpush1.bf16.msra.mxu1 %v1347_v58  ;;  %v773_v58 = vld [vmem:[%s2446_s5 + $0x208] sm:$0xff] }
 0x130   :  { %1350 = vmatprep.subr.bf16.mxu1 %v1349_v59  ;;  %v775_v59 = vld [vmem:[%s2446_s5 + $0x218] sm:$0xff] }
 0x131   :  { %v1389_v60 = vpack.c.bf16 %v775_v59, %v773_v58  ;;  %v1053_v58 = vld [vmem:[%s2449_s8] ss:$0 sm:$0xff] }
 0x133   :  { %1352 = vmatpush1.bf16.msra.mxu1 %v1351_v62  ;;  %v936_v62 = vld [vmem:[%s2448_s7 + $0x8] sm:$0xff] }
 0x134   :  { %1354 = vmatprep.subr.bf16.mxu1 %v1353_v2  ;;  %v1394_v2 = vpack.c.bf16 %v936_v62, %v935_v61 }
 0x136   :  { %1395 = vmatpush1.bf16.msra.mxu0 %v1394_v2 }
 0x137   :  { %1356 = vmatpush1.bf16.msra.mxu1 %v1355_v7  ;;  %1396 = vmatprep.subr.bf16.mxu0 %v1456_v1  ;;  %v939_v7 = vld [vmem:[%s2448_s7 + $0x20] sm:$0xff] }
 0x138   :  { %1358 = vmatprep.subr.bf16.mxu1 %v1357_v10  ;;  %v1400_v9 = vpack.c.bf16 %v940_v8, %v939_v7  ;;  %v941_v10 = vld [vmem:[%s2448_s7 + $0x30] sm:$0xff] }
 0x139   :  { %v1403_v12 = vpack.c.bf16 %v942_v11, %v941_v10 }
 0x13a   :  { %1398 = vmatpush1.bf16.msra.mxu0 %v1397_v6 }
 0x13b   :  { %1360 = vmatpush1.bf16.msra.mxu1 %v1359_v13  ;;  %1399 = vmatprep.subr.bf16.mxu0 %v1456_v1  ;;  %v943_v13 = vld [vmem:[%s2448_s7 + $0x40] sm:$0xff] }
 0x13c   :  { %1362 = vmatprep.subr.bf16.mxu1 %v1361_v17  ;;  %v1406_v15 = vpack.c.bf16 %v944_v14, %v943_v13  ;;  %v946_v17 = vld [vmem:[%s2448_s7 + $0x58] sm:$0xff] }
 0x13d   :  { %v1409_v18 = vpack.c.bf16 %v946_v17, %v945_v16 }
 0x13e   :  { %1401 = vmatpush1.bf16.msra.mxu0 %v1400_v9 }
 0x13f   :  { %1364 = vmatpush1.bf16.msra.mxu1 %v1363_v21  ;;  %1402 = vmatprep.subr.bf16.mxu0 %v1456_v1  ;;  %v1412_v21 = vpack.c.bf16 %v948_v20, %v947_v19 }
 0x140   :  { %1366 = vmatprep.subr.bf16.mxu1 %v1365_v22 }
 0x142   :  { %1404 = vmatpush1.bf16.msra.mxu0 %v1403_v12 }
 0x143   :  { %1368 = vmatpush1.bf16.msra.mxu1 %v1367_v26  ;;  %1405 = vmatprep.subr.bf16.mxu0 %v1456_v1 }
 0x144   :  { %1370 = vmatprep.subr.bf16.mxu1 %v1369_v27 }
 0x146   :  { %1407 = vmatpush1.bf16.msra.mxu0 %v1406_v15 }
 0x147   :  { %1372 = vmatpush1.bf16.msra.mxu1 %v1371_v32  ;;  %1408 = vmatprep.subr.bf16.mxu0 %v1456_v1  ;;  %v415_v32 = vrot.slane %v406_v24, %v1850_v42 }
 0x148   :  { %1374 = vmatprep.subr.bf16.mxu1 %v1373_v0 }
 0x14a   :  { %1410 = vmatpush1.bf16.msra.mxu0 %v1409_v18 }
 0x14b   :  { %1376 = vmatpush1.bf16.msra.mxu1 %v1375_v37  ;;  %1411 = vmatprep.subr.bf16.mxu0 %v1456_v1  ;;  %v1391_v37 = vpack.c.bf16 %v774_v39, %v772_v35 }
 0x14c   :  { %1378 = vmatprep.subr.bf16.mxu1 %v1377_v38 }
 0x14e   :  { %1413 = vmatpush1.bf16.msra.mxu0 %v1412_v21 }
 0x14f   :  { %1380 = vmatpush1.bf16.msra.mxu1 %v1379_v47  ;;  %1414 = vmatprep.subr.bf16.mxu0 %v1456_v1  ;;  %v951_v47 = vld [vmem:[%s2448_s7 + $0x80] sm:$0xff] }
 0x150   :  { %1382 = vmatprep.subr.bf16.mxu1 %v1381_v48 }
 0x152   :  { %1416 = vmatpush1.bf16.msra.mxu0 %v1415_v46 }
 0x153   :  { %1384 = vmatpush1.bf16.msra.mxu1 %v1383_v51  ;;  %1417 = vmatprep.subr.bf16.mxu0 %v1456_v1  ;;  %v785_v51 = vrot.slane %v776_v49, %v1850_v42 }
 0x154   :  { %1386 = vmatprep.subr.bf16.mxu1 %v1385_v54 }
 0x157   :  { %1388 = vmatpush1.bf16.msra.mxu1 %v1387_v57 }
 0x158   :  { %1390 = vmatprep.subr.bf16.mxu1 %v1389_v60 }
 0x1b6   :  { %v1087_v22 = vpop.f32.mrb[4].mxu1 }
 0x1b7   :  { %v1088_v23 = vpop.f32.mrb[5].mxu1 }
 0x1b8   :  { %v1089_v41 = vadd.f32 %v1088_v23, %v1087_v22 }
 0x1ba   :  { %v632_v28 = vadd.f32 %v1089_v41, %v419_v25 }
 0x1d6   :  { %v1122_v26 = vpop.f32.mrb[6].mxu1 }
 0x1d7   :  { %v1123_v27 = vpop.f32.mrb[7].mxu1 }
 0x1d8   :  { %v1124_v29 = vadd.f32 %v1123_v27, %v1122_v26 }
 0x1da   :  { %v702_v30 = vadd.f32 %v1124_v29, %v632_v28 }
 0x1dc   :  { %v707_v43 = vmax.f32 %v702_v30, 0.0 }
 0x1f6   :  { %v560_v0 = vpop.f32.mrb[0].mxu0 }
 0x1f7   :  { %v1420_v33 = vadd.f32 %v560_v0, %v411_v31  ;;  %v562_v34 = vpop.f32.mrb[1].mxu0 }
 0x1f8   :  { %v1421_v3 = vadd.f32 %v562_v34, %v415_v32 }
 0x1f9   :  { %v705_v38 = vmax.f32 %v1420_v33, 0.0 }
 0x1fa   :  { %v706_v36 = vmax.f32 %v1421_v3, 0.0 }
 0x1fc   :  { %855 = vmatprep.mubr.f32.mxu1 %v706_v36 }
 0x1fd   :  { %856 = vmatmul.mubr.f32.vlgmr.msra.gmra.mrb[8].mxu1 %v705_v38 }
 0x1fe   :  { %1392 = vmatpush1.bf16.msra.mxu1 %v1391_v37  ;;  %926 = vmatprep.mubr.f32.mxu1 %v1455_v5  ;;  %v952_v5 = vld [vmem:[%s2448_s7 + $0x88] sm:$0xff] }
 0x1ff   :  { %v1418_v48 = vpack.c.bf16 %v952_v5, %v951_v47 }
 0x201   :  { %1419 = vmatpush1.bf16.msra.mxu0 %v1418_v48 }
 0x205   :  { %1052 = vmatmul.mubr.msk.f32.vlgmr.msra.gmra.mrb[8].mxu1 %vm64_vm0, %v707_v43 }
 0x2d8   :  { %v928_v52 = vpop.f32.mrb[8].mxu1 }
 0x2d9   :  { %v1422_v53 = vadd.f32 %v928_v52, %v781_v50  ;;  %v930_v54 = vpop.f32.mrb[9].mxu1 }
 0x2da   :  { %v1423_v55 = vadd.f32 %v930_v54, %v785_v51 }
 0x2db   :  { %v933_v57 = vmax.f32 %v1422_v53, 0.0 }
 0x2dc   :  { %v934_v56 = vmax.f32 %v1423_v55, 0.0 }
 0x2de   :  { %1054 = vmatprep.mubr.msk.f32.mxu0 %vm64_vm0, %v934_v56 }
 0x2df   :  { %1028 = vmatmul.mubr.f32.vlgmr.msra.gmra.mrb[2].mxu0 %v933_v57 }
 0x3b2   :  { %v1029_v59 = vpop.f32.mrb[2].mxu0 }
 0x3b3   :  { %v1030_v60 = vadd.f32 %v1053_v58, %v1029_v59  ;;  %v1031_v40 = vpop.f32.mrb[3].mxu0 }
 0x3b5   :  { %v1033_v42 = vmax.f32 %v1030_v60, 0.0 }
 0x3b7   :  { %1035 = vst.msk [vmem:[#allocation2] sm:$0xf] %vm1034_vm1, %v1033_v42 }
 0x3b8   :  { %1442 = shalt.err (!%p1439_p4)
}
 0x3b9   :  { %s1443_s8 = scalar_lea.hbm %s2450_s9, 64 }
 0x3ba   :  { %p1444_p5 = scmp.ne.s32.totalorder %s2450_s9, %s1443_s8  ;;  %p1447_p6 = scmp.lt.u32.totalorder %s1443_s8, %s2450_s9 }
 0x3bc   :  { %p1449_p7 = pnand %p1447_p6, %p1444_p5 }
 0x3be   :  { %1452 = shalt.err (!%p1449_p7)
}
 0x3bf   :  { %1045 = dma.vmem_to_hbm [thread:$0]  %s1043_s6, 64, %s2450_s9, [#allocation3]  }
 0x3c0   :  { %1453 = dma.done.wait [#allocation3], 64  }
 0x3c1   :  { %1454 = vsyncadd [#allocation3], 4294967232 }
 0x3c2   :  { %1049 = vsyncpa [#allocation3], 1 }

</bundles_post_ra>
